<compile_context>
chip_gen: v5e
topology: v5e:2x2
jax: 0.10.0
libtpu: 0.0.40
codegen_flags: <defaults>
</compile_context>

<pallas_src>
import jax
import jax.numpy as jnp
from jax.experimental import pallas as pl
from jax.experimental.pallas import tpu as pltpu

_MiB = 1024 * 1024


def _round_up(n, m):
    return ((n + m - 1) // m) * m


def _padded_tile_bytes(rows, cols, itemsize):
    # VMEM tiles the last two dims to (8, 128); count the padded footprint.
    return _round_up(max(int(rows), 1), 8) * _round_up(max(int(cols), 1), 128) * itemsize


def _vmem_footprint_bytes(tm, d, c3, x_itemsize):
    buf = 0
    buf += 2 * _padded_tile_bytes(tm, d, x_itemsize)   # X tile, double-buffered
    buf += 2 * _padded_tile_bytes(d, c3, x_itemsize)   # fused weight (resident)
    buf += 2 * _padded_tile_bytes(c3, 3, 4)            # gather matrix P
    buf += 2 * _padded_tile_bytes(tm, 1, 4)            # cluster-id tile
    buf += 2 * _padded_tile_bytes(tm, 3, 4)            # output tile
    buf += 4 * _padded_tile_bytes(tm, c3, 4)           # rc / off / sel + slack
    return buf


def _lae_forward_kernel(x_ref, w_ref, p_ref, cid_ref, rgb_ref):
    # One fused MXU matmul: [TM, D] @ [D, 3C] -> [TM, 3C], f32 accumulation.
    rc = jnp.dot(x_ref[...], w_ref[...], preferred_element_type=jnp.float32)

    # Window mask: keep columns [3*cid, 3*cid + 3) of this row (single select).
    off = jax.lax.broadcasted_iota(jnp.int32, rc.shape, 1) - 3 * cid_ref[...]
    sel = jnp.where((off >= 0) & (off < 3), rc, 0.0)

    # Gather-as-matmul on the (otherwise idle) MXU: P[c, j] = (c % 3 == j),
    # so rgb[i, j] = rc[i, 3*cid[i] + j].  Out-of-range cid -> zeros.
    rgb = jnp.dot(sel, p_ref[...], preferred_element_type=jnp.float32)
    rgb_ref[...] = rgb.astype(rgb_ref.dtype)


def linear_autoencoder_forward(x, w_pos, w_feat, cluster_ids,
                               linear_mappings=None, *, tm=8192):
    """Pallas implementation of LinearAutoEncoder.forward.

    x:               [N, pos_size + latent_size]
    w_pos:           [3*num_clusters, pos_size]    (pos_mapping.weight)
    w_feat:          [3*num_clusters, latent_size] (feature_mapping.weight)
    cluster_ids:     [N] int, values in [0, num_clusters)
    linear_mappings: optional [num_clusters, 3, D] (training-mode branch).
    returns:         [N, 3] in x.dtype
    """
    N, D = x.shape
    pos_size = w_pos.shape[1]
    assert w_pos.shape[0] == w_feat.shape[0]
    assert pos_size + w_feat.shape[1] == D

    if linear_mappings is not None:
        # Training-mode weight re-derivation, exactly like the module.
        lm = linear_mappings.reshape(-1, linear_mappings.shape[-1])  # [3C, D]
        w_pos, w_feat = lm[:, :pos_size], lm[:, pos_size:]

    # Fused + pre-transposed weight (one-time wrapper layout work):
    #   rc = x @ [W_pos | W_feat].T  ==  x @ W_full,  W_full: [D, 3C]
    w_full = jnp.concatenate([w_pos, w_feat], axis=1).T.astype(x.dtype)
    c3 = w_full.shape[1]

    # Constant gather matrix: P[c, j] = 1 iff c % 3 == j.
    p_sel = (jnp.arange(c3)[:, None] % 3 == jnp.arange(3)[None, :]).astype(jnp.float32)

    cid = cluster_ids.astype(jnp.int32).reshape(N, 1)

    # ---- Row-tile sizing (no padding of X; ragged tail handled by Pallas) ----
    tm = max(8, (int(tm) // 8) * 8)
    # Keep >= 2 grid steps so v7x's two TensorCores both get work.
    tm = min(tm, max(8, _round_up(pl.cdiv(N, 2), 8)))

    try:
        vmem_cap = int(getattr(pltpu.get_tpu_info(), "vmem_capacity_bytes", 64 * _MiB))
    except Exception:  # pragma: no cover - conservative fallback
        vmem_cap = 64 * _MiB                       # v7x per-TC physical VMEM
    budget = min(vmem_cap // 2, 48 * _MiB)         # v7x: 32 MiB, v5e/v6e: 48 MiB
    x_itemsize = jnp.dtype(x.dtype).itemsize
    while tm > 8 and _vmem_footprint_bytes(tm, D, c3, x_itemsize) > budget:
        tm = max(8, _round_up(tm // 2, 8))
    vmem_limit = int(min(
        vmem_cap,
        max(_vmem_footprint_bytes(tm, D, c3, x_itemsize) + 8 * _MiB, 24 * _MiB)))

    grid = (pl.cdiv(N, tm),)

    out = pl.pallas_call(
        _lae_forward_kernel,
        out_shape=jax.ShapeDtypeStruct((N, 3), x.dtype),
        grid=grid,
        in_specs=[
            pl.BlockSpec((tm, D), lambda i: (i, 0)),    # X row tile (pipelined)
            pl.BlockSpec((D, c3), lambda i: (0, 0)),    # fused weight, resident
            pl.BlockSpec((c3, 3), lambda i: (0, 0)),    # gather matrix, resident
            pl.BlockSpec((tm, 1), lambda i: (i, 0)),    # cluster ids row tile
        ],
        out_specs=pl.BlockSpec((tm, 3), lambda i: (i, 0)),
        compiler_params=pltpu.CompilerParams(
            dimension_semantics=("parallel",),          # dual-TC sharding on v7x
            vmem_limit_bytes=vmem_limit,
        ),
    )(x, w_full, p_sel, cid)

    return out


def _reference_forward(x, w_pos, w_feat, cluster_ids):
    pos_size = w_pos.shape[1]
    rc = x[:, :pos_size] @ w_pos.T + x[:, pos_size:] @ w_feat.T     # [N, 3C]
    cols = jnp.stack([3 * cluster_ids, 3 * cluster_ids + 1, 3 * cluster_ids + 2])
    rows = jnp.arange(x.shape[0])
    return rc[rows, cols].T                                          # [N, 3]


if __name__ == "__main__":
    # Deterministic small shapes consistent with the module's forward():
    N = 300              # deliberately not a multiple of the row tile (ragged tail)
    pos_size = 8
    latent_size = 24
    num_clusters = 16
    D = pos_size + latent_size

    key = jax.random.PRNGKey(0)
    kx, kwp, kwf, kc = jax.random.split(key, 4)

    x = jax.random.normal(kx, (N, D), dtype=jnp.float32)
    # Synthetic deterministic weights (nn.Linear-style uniform init, bias=False).
    w_pos = jax.random.uniform(
        kwp, (3 * num_clusters, pos_size), dtype=jnp.float32,
        minval=-1.0 / (pos_size ** 0.5), maxval=1.0 / (pos_size ** 0.5))
    w_feat = jax.random.uniform(
        kwf, (3 * num_clusters, latent_size), dtype=jnp.float32,
        minval=-1.0 / (latent_size ** 0.5), maxval=1.0 / (latent_size ** 0.5))
    cluster_ids = jax.random.randint(kc, (N,), 0, num_clusters, dtype=jnp.int32)

    ref = _reference_forward(x, w_pos, w_feat, cluster_ids)

    # Eval-mode path (weights from the Linear layers).
    rgb = linear_autoencoder_forward(x, w_pos, w_feat, cluster_ids)
    rgb = jax.block_until_ready(rgb)
    assert rgb.shape == (N, 3), rgb.shape
    assert jnp.allclose(rgb, ref, atol=1e-5, rtol=1e-5), float(jnp.abs(rgb - ref).max())

    # Training-mode path (weights re-derived from linear_mappings).
    lm = jnp.concatenate([w_pos, w_feat], axis=1).reshape(num_clusters, 3, D)
    rgb_tr = linear_autoencoder_forward(x, w_pos * 0, w_feat * 0, cluster_ids,
                                        linear_mappings=lm)
    rgb_tr = jax.block_until_ready(rgb_tr)
    assert jnp.allclose(rgb_tr, ref, atol=1e-5, rtol=1e-5), \
        float(jnp.abs(rgb_tr - ref).max())

    # TODO(synk): the unused `encoder` MLP (encode()) and the pinv-based
    # compute_linear_mappings() host utility are not part of forward() and are
    # intentionally not implemented as kernels.
    print("KERNEL_OK")
</pallas_src>

<mosaic_0001>
module attributes {stable_mosaic.version = 11 : i64} {
  func.func @_lae_forward_kernel(%arg0: i32, %arg1: memref<152x32xf32, #tpu.memory_space<vmem>>, %arg2: memref<32x48xf32, #tpu.memory_space<vmem>>, %arg3: memref<48x3xf32, #tpu.memory_space<vmem>>, %arg4: memref<152x1xi32, #tpu.memory_space<vmem>>, %arg5: memref<152x3xf32, #tpu.memory_space<vmem>>) attributes {dimension_semantics = [#tpu.dimension_semantics<parallel>], iteration_bounds = array<i64: 2>, scalar_prefetch = 0 : i64, scratch_operands = 0 : i64, tpu.core_type = #tpu.core_type<tc>, window_params = [{transform_indices = @transform_0, window_bounds = array<i64: 152, 32>}, {pipeline_mode = #tpu.pipeline_mode<synchronous>, transform_indices = @transform_1, window_bounds = array<i64: 32, 48>}, {pipeline_mode = #tpu.pipeline_mode<synchronous>, transform_indices = @transform_2, window_bounds = array<i64: 48, 3>}, {transform_indices = @transform_3, window_bounds = array<i64: 152, 1>}, {transform_indices = @transform_4, window_bounds = array<i64: 152, 3>}]} {
    %c0 = arith.constant 0 : index
    %c0_0 = arith.constant 0 : index
    %0 = vector.load %arg1[%c0, %c0_0] : memref<152x32xf32, #tpu.memory_space<vmem>>, vector<152x32xf32>
    %c0_1 = arith.constant 0 : index
    %c0_2 = arith.constant 0 : index
    %1 = vector.load %arg2[%c0_1, %c0_2] : memref<32x48xf32, #tpu.memory_space<vmem>>, vector<32x48xf32>
    %cst = arith.constant dense<0.000000e+00> : vector<152x48xf32>
    %2 = tpu.matmul %0, %1, %cst {dimension_numbers = #tpu.dot_dimension_numbers<[1], [0], [0], [1], [0, 0, 1, 1], [], []>} : vector<152x32xf32>, vector<32x48xf32>, vector<152x48xf32> -> vector<152x48xf32>
    %3 = tpu.iota {dimensions = array<i32: 1>} : vector<152x48xi32>
    %c0_3 = arith.constant 0 : index
    %c0_4 = arith.constant 0 : index
    %4 = vector.load %arg4[%c0_3, %c0_4] : memref<152x1xi32, #tpu.memory_space<vmem>>, vector<152x1xi32>
    %c3_i32 = arith.constant 3 : i32
    %5 = vector.broadcast %c3_i32 : i32 to vector<152x1xi32>
    %6 = arith.muli %5, %4 : vector<152x1xi32>
    %7 = vector.broadcast %6 : vector<152x1xi32> to vector<152x48xi32>
    %8 = arith.subi %3, %7 : vector<152x48xi32>
    %c0_i32 = arith.constant 0 : i32
    %9 = vector.broadcast %c0_i32 : i32 to vector<152x48xi32>
    %10 = arith.cmpi sge, %8, %9 : vector<152x48xi32>
    %c3_i32_5 = arith.constant 3 : i32
    %11 = vector.broadcast %c3_i32_5 : i32 to vector<152x48xi32>
    %12 = arith.cmpi slt, %8, %11 : vector<152x48xi32>
    %13 = arith.andi %10, %12 : vector<152x48xi1>
    %cst_6 = arith.constant 0.000000e+00 : f32
    %14 = vector.broadcast %cst_6 : f32 to vector<152x48xf32>
    %15 = arith.select %13, %2, %14 : vector<152x48xi1>, vector<152x48xf32>
    %c0_7 = arith.constant 0 : index
    %c0_8 = arith.constant 0 : index
    %16 = vector.load %arg3[%c0_7, %c0_8] : memref<48x3xf32, #tpu.memory_space<vmem>>, vector<48x3xf32>
    %cst_9 = arith.constant dense<0.000000e+00> : vector<152x3xf32>
    %17 = tpu.matmul %15, %16, %cst_9 {dimension_numbers = #tpu.dot_dimension_numbers<[1], [0], [0], [1], [0, 0, 1, 1], [], []>} : vector<152x48xf32>, vector<48x3xf32>, vector<152x3xf32> -> vector<152x3xf32>
    %c0_10 = arith.constant 0 : index
    %c0_11 = arith.constant 0 : index
    %18 = vector.load %arg5[%c0_10, %c0_11] : memref<152x3xf32, #tpu.memory_space<vmem>>, vector<152x3xf32>
    tpu.vector_store %arg5[%c0_10, %c0_11], %17 {strides = array<i32>} : memref<152x3xf32, #tpu.memory_space<vmem>>, vector<152x3xf32>,
    return
  }
  func.func @transform_0(%arg0: i32) -> (i32, i32) {
    %c0_i32 = arith.constant 0 : i32
    %c0_i32_0 = arith.constant 0 : i32
    return %arg0, %c0_i32 : i32, i32
  }
  func.func @transform_1(%arg0: i32) -> (i32, i32) {
    %c0_i32 = arith.constant 0 : i32
    %c0_i32_0 = arith.constant 0 : i32
    %c0_i32_1 = arith.constant 0 : i32
    return %c0_i32, %c0_i32_0 : i32, i32
  }
  func.func @transform_2(%arg0: i32) -> (i32, i32) {
    %c0_i32 = arith.constant 0 : i32
    %c0_i32_0 = arith.constant 0 : i32
    %c0_i32_1 = arith.constant 0 : i32
    return %c0_i32, %c0_i32_0 : i32, i32
  }
  func.func @transform_3(%arg0: i32) -> (i32, i32) {
    %c0_i32 = arith.constant 0 : i32
    %c0_i32_0 = arith.constant 0 : i32
    return %arg0, %c0_i32 : i32, i32
  }
  func.func @transform_4(%arg0: i32) -> (i32, i32) {
    %c0_i32 = arith.constant 0 : i32
    %c0_i32_0 = arith.constant 0 : i32
    return %arg0, %c0_i32 : i32, i32
  }
}

</mosaic_0001>

<bundles_post_ra>
// kernel: tpu_custom_call.1
= control target key start
LH: loop header
LB: loop body
LE: loop exit
PB: predicated region body
PF: predicated region fallthrough
CT: control target
= control target key end

     0   :  { %s900_s15 = smov 0   ;;  %s1123_s0 = inlined_call_operand.vmem [shape: f32[300,32], index: 0, kind: input, shape index: {}]   ;;  %s1124_s1 = inlined_call_operand.vmem [shape: f32[32,48], index: 1, kind: input, shape index: {}]   ;;  %s1125_s2 = inlined_call_operand.vmem [shape: f32[48,3], index: 2, kind: input, shape index: {}]   ;;  %s1126_s3 = inlined_call_operand.vmem [shape: s32[300,1], index: 3, kind: input, shape index: {}]   ;;  %s1127_s4 = inlined_call_operand.vmem [shape: f32[300,3], index: 4, kind: output, shape index: {}]  }
   0x1 LB: > { %s796_s16 = sadd.s32 4294967295, %s872_s15   ;;  %p800_p0 = scmp.ge.s32.totalorder %s872_s15, 1  ;;  %s872_s15 = sphi %s900_s15, %s14_s15  }
   0x2   : > { %p174_p1 = scmp.lt.s32.totalorder %s872_s15, 3 }
   0x4   : > { %p175_p2 = pnand %p800_p0, %p174_p1 }
   0x5   : > { %s205_s21 = smul.u32 (!%p175_p2), 19, %s796_s16 }
   0x6   : > { %178 = sbr.rel (%p175_p2) target bundleno = 423 (0x1a7), region = 36 }
   0x7   : > { %p206_p3 = scmp.lt.s32.totalorder (!%p175_p2), %s205_s21, 37 }
   0xb   : > { %v245_v0 = vld [vmem:[%s1124_s1 + $0x18] sm:$0xff]  ;;  %v244_v1 = vld [vmem:[%s1124_s1 + $0x10] sm:$0xff]  ;;  %v243_v2 = vld [vmem:[%s1124_s1 + $0x8] sm:$0xff]  ;;  %v874_v3 = vmov 0   ;;  %s1129_s21 = smov (!%p206_p3, %s205_s21), 37  ;;  %vm246_vm0 = vcmask 261120  }
   0xc   : > { %316 = vmatpush.msra.mxu0 %v245_v0  ;;  %844 = vmatpush.msra.mxu3 %v245_v0  ;;  %v242_v4 = vld [vmem:[%s1124_s1] sm:$0xff]  ;;  %s920_s26 = sshll.u32 %s1129_s21, 3  ;;  %v575_v50 = vld [vmem:[%s1125_s2 + $0x28] sm:$0xff]  ;;  %v573_v53 = vld [vmem:[%s1125_s2 + $0x18] sm:$0xff]  ;;  %vm576_vm4 = vcmask 392192  }
   0xd   : > { %864 = vset.pattern.permute.xlu1 %v874_v3  ;;  %863 = vset.pattern.permute.xlu0 %v874_v3  ;;  %s926_s29 = scalar_lea.vmem %s1123_s0, %s920_s26  ;;  %s932_s6 = scalar_lea.vmem %s1126_s3, %s920_s26  ;;  %v574_v52 = vld [vmem:[%s1125_s2 + $0x20] sm:$0xff] }
   0xe   : > { %317 = vmatpush.msra.mxu0 %v244_v1  ;;  %845 = vmatpush.msra.mxu3 %v244_v1  ;;  %v223_v5 = vld [vmem:[%s926_s29] sm:$0xff]  ;;  %v389_v6 = vld [vmem:[%s932_s6 + $0x48] sm:$0xff]  ;;  %v233_v10 = vld [vmem:[%s926_s29 + $0x50] sm:$0xff]  ;;  %s1074_s22 = scalar_lea.vmem %s1127_s4, %s920_s26 }
   0xf   : > { %865 = vset.pattern.permute.xlu2 %v874_v3  ;;  %v380_v7 = vld [vmem:[%s932_s6] sm:$0xff]  ;;  %v408_v8 = vmul.u32 3, %v389_v6  ;;  %v390_v11 = vld [vmem:[%s932_s6 + $0x50] sm:$0xff]  ;;  %v391_v12 = vld [vmem:[%s932_s6 + $0x58] sm:$0xff]  ;;  %644 = vmatpush.msra.mxu1 %v575_v50 }
  0x10   : > { %318 = vmatpush.msra.mxu0 %v243_v2  ;;  %846 = vmatpush.msra.mxu3 %v243_v2  ;;  %v399_v9 = vmul.u32 3, %v380_v7  ;;  %v381_v13 = vld [vmem:[%s932_s6 + $0x8] sm:$0xff]  ;;  %v409_v16 = vmul.u32 3, %v390_v11  ;;  %v234_v17 = vld [vmem:[%s926_s29 + $0x58] sm:$0xff]  ;;  %v410_v18 = vmul.u32 3, %v391_v12  ;;  %v392_v19 = vld [vmem:[%s932_s6 + $0x60] sm:$0xff] }
  0x11   : > { %446 = vperm.xlu0 %863, %v408_v8   ;;  %v224_v14 = vld [vmem:[%s926_s29 + $0x8] sm:$0xff]  ;;  %v400_v15 = vmul.u32 3, %v381_v13  ;;  %v382_v20 = vld [vmem:[%s932_s6 + $0x10] sm:$0xff]  ;;  %v411_v22 = vmul.u32 3, %v392_v19  ;;  %v235_v25 = vld [vmem:[%s926_s29 + $0x60] sm:$0xff]  ;;  %645 = vmatpush.msra.mxu1 %v574_v52 }
  0x12   : > { %319 = vmatpush.msra.mxu0 %v242_v4  ;;  %847 = vmatpush.msra.mxu3 %v242_v4  ;;  %v393_v21 = vld [vmem:[%s932_s6 + $0x68] sm:$0xff]  ;;  %v225_v23 = vld [vmem:[%s926_s29 + $0x10] sm:$0xff]  ;;  %v401_v24 = vmul.u32 3, %v382_v20  ;;  %v383_v27 = vld [vmem:[%s932_s6 + $0x18] sm:$0xff]  ;;  %v378_v4 = vlaneseq }
  0x13   : > { %804 = vmatmul.msk.f32.vlgmr.msra.gmra.mxu0 %vm246_vm0, %v223_v5  ;;  %814 = vmatmul.msk.f32.vlgmr.msra.gmra.mxu3 %vm246_vm0, %v233_v10  ;;  %v412_v26 = vmul.u32 3, %v393_v21  ;;  %v394_v28 = vld [vmem:[%s932_s6 + $0x70] sm:$0xff]  ;;  %v384_v29 = vld [vmem:[%s932_s6 + $0x20] sm:$0xff]  ;;  %v402_v30 = vmul.u32 3, %v383_v27  ;;  %v226_v31 = vld [vmem:[%s926_s29 + $0x18] sm:$0xff] }
  0x14   : > { %419 = vperm.xlu1 %864, %v399_v9   ;;  %422 = vperm.xlu2 %865, %v400_v15   ;;  %v236_v32 = vld [vmem:[%s926_s29 + $0x68] sm:$0xff]  ;;  %v413_v33 = vmul.u32 3, %v394_v28  ;;  %v403_v34 = vmul.u32 3, %v384_v29  ;;  %v396_v36 = vld [vmem:[%s932_s6 + $0x80] sm:$0xff]  ;;  %v237_v38 = vld [vmem:[%s926_s29 + $0x70] sm:$0xff]  ;;  %v1009_v5 = vand.u32 127, %v378_v4 }
  0x15   : > { %v385_v35 = vld [vmem:[%s932_s6 + $0x28] sm:$0xff]  ;;  %v227_v37 = vld [vmem:[%s926_s29 + $0x20] sm:$0xff]  ;;  %v415_v40 = vmul.u32 3, %v396_v36  ;;  %v395_v41 = vld [vmem:[%s932_s6 + $0x78] sm:$0xff]  ;;  %848 = vmatpush.msra.mxu2 %v575_v50  ;;  %646 = vmatpush.msra.mxu1 %v573_v53 }
  0x16   : > { %v404_v39 = vmul.u32 3, %v385_v35  ;;  %v414_v42 = vmul.u32 3, %v395_v41  ;;  %v397_v43 = vld [vmem:[%s932_s6 + $0x88] sm:$0xff]  ;;  %v387_v44 = vld [vmem:[%s932_s6 + $0x38] sm:$0xff]  ;;  %v386_v49 = vld [vmem:[%s932_s6 + $0x30] sm:$0xff] }
  0x17   : > { %v228_v45 = vld [vmem:[%s926_s29 + $0x28] sm:$0xff]  ;;  %v238_v46 = vld [vmem:[%s926_s29 + $0x78] sm:$0xff]  ;;  %v416_v47 = vmul.u32 3, %v397_v43  ;;  %v406_v48 = vmul.u32 3, %v387_v44  ;;  %v405_v51 = vmul.u32 3, %v386_v49  ;;  %v388_v54 = vld [vmem:[%s932_s6 + $0x40] sm:$0xff]  ;;  %849 = vmatpush.msra.mxu2 %v574_v52 }
  0x18   : > { %v398_v55 = vld [vmem:[%s932_s6 + $0x90] sm:$0xff]  ;;  %v239_v57 = vld [vmem:[%s926_s29 + $0x80] sm:$0xff]  ;;  %v407_v58 = vmul.u32 3, %v388_v54  ;;  %v230_v60 = vld [vmem:[%s926_s29 + $0x38] sm:$0xff] }
  0x19   : > { %449 = vperm.xlu0 %863, %v409_v16   ;;  %v229_v56 = vld [vmem:[%s926_s29 + $0x30] sm:$0xff]  ;;  %v417_v59 = vmul.u32 3, %v398_v55  ;;  %850 = vmatpush.msra.mxu2 %v573_v53  ;;  %v240_v61 = vld [vmem:[%s926_s29 + $0x88] sm:$0xff]  ;;  %v231_v62 = vld [vmem:[%s926_s29 + $0x40] sm:$0xff] }
  0x1a   : > { %v241_v63 = vld [vmem:[%s926_s29 + $0x90] sm:$0xff]  ;;  %v232_v0 = vld [vmem:[%s926_s29 + $0x48] sm:$0xff]  ;;  %v570_v3 = vld [vmem:[%s1125_s2] sm:$0xff] }
  0x1b   : > { %805 = vmatmul.msk.f32.gmra.mxu0 %vm246_vm0, %v224_v14  ;;  %815 = vmatmul.msk.f32.gmra.mxu3 %vm246_vm0, %v234_v17  ;;  %v572_v1 = vld [vmem:[%s1125_s2 + $0x10] sm:$0xff]  ;;  %v571_v2 = vld [vmem:[%s1125_s2 + $0x8] sm:$0xff] }
  0x1c   : > { %452 = vperm.xlu1 %864, %v410_v18   ;;  %455 = vperm.xlu2 %865, %v411_v22  }
  0x1d   : > { %647 = vmatpush.msra.mxu1 %v572_v1  ;;  %851 = vmatpush.msra.mxu2 %v572_v1 }
  0x1f   : > { %648 = vmatpush.msra.mxu1 %v571_v2  ;;  %852 = vmatpush.msra.mxu2 %v571_v2 }
  0x21   : > { %425 = vperm.xlu0 %863, %v401_v24   ;;  %649 = vmatpush.msra.mxu1 %v570_v3 }
  0x22   : > { %853 = vmatpush.msra.mxu2 %v570_v3 }
  0x23   : > { %806 = vmatmul.msk.f32.gmra.mxu0 %vm246_vm0, %v225_v23  ;;  %816 = vmatmul.msk.f32.gmra.mxu3 %vm246_vm0, %v235_v25 }
  0x24   : > { %458 = vperm.xlu1 %864, %v412_v26   ;;  %428 = vperm.xlu2 %865, %v402_v30  }
  0x29   : > { %461 = vperm.xlu0 %863, %v413_v33  }
  0x2b   : > { %807 = vmatmul.msk.f32.gmra.mxu0 %vm246_vm0, %v226_v31  ;;  %817 = vmatmul.msk.f32.gmra.mxu3 %vm246_vm0, %v236_v32 }
  0x2c   : > { %431 = vperm.xlu1 %864, %v403_v34   ;;  %464 = vperm.xlu2 %865, %v414_v42  }
  0x31   : > { %434 = vperm.xlu0 %863, %v404_v39  }
  0x33   : > { %808 = vmatmul.msk.f32.gmra.mxu0 %vm246_vm0, %v227_v37  ;;  %818 = vmatmul.msk.f32.gmra.mxu3 %vm246_vm0, %v237_v38 }
  0x34   : > { %467 = vperm.xlu1 %864, %v415_v40   ;;  %437 = vperm.xlu2 %865, %v405_v51  }
  0x39   : > { %470 = vperm.xlu0 %863, %v416_v47  }
  0x3b   : > { %809 = vmatmul.msk.f32.gmra.mxu0 %vm246_vm0, %v228_v45  ;;  %819 = vmatmul.msk.f32.gmra.mxu3 %vm246_vm0, %v238_v46 }
  0x3c   : > { %440 = vperm.xlu1 %864, %v406_v48   ;;  %473 = vperm.xlu2 %865, %v417_v59  }
  0x41   : > { %443 = vperm.xlu0 %863, %v407_v58  }
  0x43   : > { %810 = vmatmul.msk.f32.gmra.mxu0 %vm246_vm0, %v229_v56  ;;  %820 = vmatmul.msk.f32.gmra.mxu3 %vm246_vm0, %v239_v57 }
  0x4b   : > { %811 = vmatmul.msk.f32.gmra.mxu0 %vm246_vm0, %v230_v60  ;;  %821 = vmatmul.msk.f32.gmra.mxu3 %vm246_vm0, %v240_v61 }
  0x53   : > { %812 = vmatmul.msk.f32.gmra.mxu0 %vm246_vm0, %v231_v62  ;;  %822 = vmatmul.msk.f32.gmra.mxu3 %vm246_vm0, %v241_v63 }
  0x5b   : > { %813 = vmatmul.msk.f32.gmra.mxu0 %vm246_vm0, %v232_v0 }
  0x6e   : > { %v423_v9 = vpop.permute.xlu2 %422 }
  0x6f   : > { %v476_v11 = vsub.s32 %v1009_v5, %v423_v9 }
  0x71   : > { %vm495_vm5 = vcmp.ge.s32.totalorder %v476_v11, 0  ;;  %vm514_vm6 = vcmp.lt.s32.totalorder %v476_v11, 3 }
  0x72   : > { %vm533_vm7 = vmand %vm495_vm5, %vm514_vm6 }
  0x76   : > { %v1020_v15 = vpop.permute.xlu2 %455 }
  0x77   : > { %v487_v60 = vsub.s32 %v1009_v5, %v1020_v15 }
  0x7e   : > { %v429_v21 = vpop.permute.xlu2 %428 }
  0x7f   : > { %v478_v22 = vsub.s32 %v1009_v5, %v429_v21 }
  0x81   : > { %vm497_vm11 = vcmp.ge.s32.totalorder %v478_v22, 0  ;;  %vm516_vm12 = vcmp.lt.s32.totalorder %v478_v22, 3 }
  0x82   : > { %vm535_vm13 = vmand %vm497_vm11, %vm516_vm12 }
  0x83   : > { %v1011_v6 = vpop.permute.xlu0 %446 }
  0x84   : > { %v484_v49 = vsub.s32 %v1009_v5, %v1011_v6 }
  0x86   : > { %v420_v7 = vpop.permute.xlu1 %419  ;;  %v1032_v30 = vpop.permute.xlu2 %464 }
  0x87   : > { %v475_v8 = vsub.s32 %v1009_v5, %v420_v7  ;;  %v490_v4 = vsub.s32 %v1009_v5, %v1032_v30 }
  0x89   : > { %vm494_vm1 = vcmp.ge.s32.totalorder %v475_v8, 0  ;;  %vm513_vm2 = vcmp.lt.s32.totalorder %v475_v8, 3 }
  0x8a   : > { %vm532_vm3 = vmand %vm494_vm1, %vm513_vm2 }
  0x8b   : > { %v1014_v10 = vpop.permute.xlu0 %449 }
  0x8c   : > { %v485_v53 = vsub.s32 %v1009_v5, %v1014_v10 }
  0x8e   : > { %v1017_v13 = vpop.permute.xlu1 %452  ;;  %v438_v36 = vpop.permute.xlu2 %437 }
  0x8f   : > { %v481_v37 = vsub.s32 %v1009_v5, %v438_v36  ;;  %v486_v57 = vsub.s32 %v1009_v5, %v1017_v13 }
  0x90   : > { %v321_v12 = vpop.f32.mrf.mxu0 }
  0x91   : > { %v551_v14 = vsel %vm532_vm3, %v321_v12, 0.0  ;;  %vm500_vm5 = vcmp.ge.s32.totalorder %v481_v37, 0  ;;  %vm519_vm6 = vcmp.lt.s32.totalorder %v481_v37, 3 }
  0x92   : > { %823 = vmatmul.msk.f32.vlgmr.msra.gmra.mxu1 %vm576_vm4, %v551_v14 }
  0x93   : > { %v426_v16 = vpop.permute.xlu0 %425 }
  0x94   : > { %v477_v18 = vsub.s32 %v1009_v5, %v426_v16 }
  0x96   : > { %v1024_v20 = vpop.permute.xlu1 %458  ;;  %vm496_vm8 = vcmp.ge.s32.totalorder %v477_v18, 0  ;;  %vm515_vm9 = vcmp.lt.s32.totalorder %v477_v18, 3  ;;  %v351_v50 = vpop.f32.mrf.mxu3 }
  0x97   : > { %vm534_vm10 = vmand %vm496_vm8, %vm515_vm9  ;;  %v488_v63 = vsub.s32 %v1009_v5, %v1024_v20  ;;  %v474_v14 = vpop.permute.xlu2 %473 }
  0x98   : > { %v324_v17 = vpop.f32.mrf.mxu0  ;;  %v493_v16 = vsub.s32 %v1009_v5, %v474_v14 }
  0x99   : > { %v552_v19 = vsel %vm533_vm7, %v324_v17, 0.0  ;;  %vm538_vm7 = vmand %vm500_vm5, %vm519_vm6  ;;  %vm505_vm5 = vcmp.ge.s32.totalorder %v486_v57, 0  ;;  %vm524_vm6 = vcmp.lt.s32.totalorder %v486_v57, 3 }
  0x9a   : > { %824 = vmatmul.msk.f32.gmra.mxu1 %vm576_vm4, %v552_v19 }
  0x9b   : > { %v1028_v25 = vpop.permute.xlu0 %461 }
  0x9c   : > { %v489_v1 = vsub.s32 %v1009_v5, %v1028_v25 }
  0x9e   : > { %v432_v26 = vpop.permute.xlu1 %431  ;;  %v354_v56 = vpop.f32.mrf.mxu3 }
  0x9f   : > { %v479_v27 = vsub.s32 %v1009_v5, %v432_v26 }
  0xa0   : > { %v327_v23 = vpop.f32.mrf.mxu0 }
  0xa1   : > { %v553_v24 = vsel %vm534_vm10, %v327_v23, 0.0  ;;  %vm498_vm14 = vcmp.ge.s32.totalorder %v479_v27, 0  ;;  %vm517_vm15 = vcmp.lt.s32.totalorder %v479_v27, 3 }
  0xa2   : > { %825 = vmatmul.msk.f32.gmra.mxu1 %vm576_vm4, %v553_v24  ;;  %vm536_vm0 = vmand %vm498_vm14, %vm517_vm15  ;;  %vm503_vm14 = vcmp.ge.s32.totalorder %v484_v49, 0  ;;  %vm522_vm15 = vcmp.lt.s32.totalorder %v484_v49, 3 }
  0xa3   : > { %v435_v31 = vpop.permute.xlu0 %434 }
  0xa4   : > { %v480_v32 = vsub.s32 %v1009_v5, %v435_v31 }
  0xa6   : > { %v1036_v35 = vpop.permute.xlu1 %467  ;;  %vm499_vm1 = vcmp.ge.s32.totalorder %v480_v32, 0  ;;  %vm518_vm2 = vcmp.lt.s32.totalorder %v480_v32, 3  ;;  %v357_v59 = vpop.f32.mrf.mxu3 }
  0xa7   : > { %vm537_vm3 = vmand %vm499_vm1, %vm518_vm2  ;;  %vm504_vm1 = vcmp.ge.s32.totalorder %v485_v53, 0  ;;  %vm523_vm2 = vcmp.lt.s32.totalorder %v485_v53, 3  ;;  %v491_v8 = vsub.s32 %v1009_v5, %v1036_v35 }
  0xa8   : > { %v330_v28 = vpop.f32.mrf.mxu0 }
  0xa9   : > { %v554_v29 = vsel %vm535_vm13, %v330_v28, 0.0 }
  0xaa   : > { %826 = vmatmul.msk.f32.gmra.mxu1 %vm576_vm4, %v554_v29 }
  0xab   : > { %v1040_v40 = vpop.permute.xlu0 %470 }
  0xac   : > { %v492_v11 = vsub.s32 %v1009_v5, %v1040_v40 }
  0xae   : > { %v441_v41 = vpop.permute.xlu1 %440  ;;  %v360_v62 = vpop.f32.mrf.mxu3 }
  0xaf   : > { %v482_v42 = vsub.s32 %v1009_v5, %v441_v41 }
  0xb0   : > { %v333_v33 = vpop.f32.mrf.mxu0 }
  0xb1   : > { %v555_v34 = vsel %vm536_vm0, %v333_v33, 0.0  ;;  %vm501_vm8 = vcmp.ge.s32.totalorder %v482_v42, 0  ;;  %vm520_vm9 = vcmp.lt.s32.totalorder %v482_v42, 3  ;;  %vm541_vm0 = vmand %vm503_vm14, %vm522_vm15  ;;  %vm508_vm14 = vcmp.ge.s32.totalorder %v489_v1, 0 }
  0xb2   : > { %827 = vmatmul.msk.f32.gmra.mxu1 %vm576_vm4, %v555_v34  ;;  %vm539_vm10 = vmand %vm501_vm8, %vm520_vm9  ;;  %vm506_vm8 = vcmp.ge.s32.totalorder %v487_v60, 0  ;;  %vm525_vm9 = vcmp.lt.s32.totalorder %v487_v60, 3  ;;  %vm527_vm15 = vcmp.lt.s32.totalorder %v489_v1, 3 }
  0xb3   : > { %v444_v45 = vpop.permute.xlu0 %443 }
  0xb4   : > { %v483_v46 = vsub.s32 %v1009_v5, %v444_v45 }
  0xb6   : > { %vm502_vm11 = vcmp.ge.s32.totalorder %v483_v46, 0  ;;  %vm521_vm12 = vcmp.lt.s32.totalorder %v483_v46, 3  ;;  %v363_v2 = vpop.f32.mrf.mxu3 }
  0xb7   : > { %vm540_vm13 = vmand %vm502_vm11, %vm521_vm12  ;;  %vm507_vm11 = vcmp.ge.s32.totalorder %v488_v63, 0  ;;  %vm526_vm12 = vcmp.lt.s32.totalorder %v488_v63, 3 }
  0xb8   : > { %v336_v38 = vpop.f32.mrf.mxu0 }
  0xb9   : > { %v556_v39 = vsel %vm537_vm3, %v336_v38, 0.0  ;;  %vm542_vm3 = vmand %vm504_vm1, %vm523_vm2  ;;  %vm509_vm1 = vcmp.ge.s32.totalorder %v490_v4, 0  ;;  %vm528_vm2 = vcmp.lt.s32.totalorder %v490_v4, 3 }
  0xba   : > { %828 = vmatmul.msk.f32.gmra.mxu1 %vm576_vm4, %v556_v39  ;;  %v561_v58 = vsel %vm542_vm3, %v351_v50, 0.0  ;;  %vm547_vm3 = vmand %vm509_vm1, %vm528_vm2 }
  0xbe   : > { %v366_v7 = vpop.f32.mrf.mxu3 }
  0xbf   : > { %v566_v9 = vsel %vm547_vm3, %v366_v7, 0.0 }
  0xc0   : > { %v339_v43 = vpop.f32.mrf.mxu0 }
  0xc1   : > { %v557_v44 = vsel %vm538_vm7, %v339_v43, 0.0  ;;  %vm543_vm7 = vmand %vm505_vm5, %vm524_vm6  ;;  %vm510_vm5 = vcmp.ge.s32.totalorder %v491_v8, 0  ;;  %vm529_vm6 = vcmp.lt.s32.totalorder %v491_v8, 3 }
  0xc2   : > { %829 = vmatmul.msk.f32.gmra.mxu1 %vm576_vm4, %v557_v44  ;;  %v562_v61 = vsel %vm543_vm7, %v354_v56, 0.0  ;;  %vm708_vm7 = vcmask 23552  }
  0xc6   : > { %v369_v10 = vpop.f32.mrf.mxu3 }
  0xc8   : > { %v342_v47 = vpop.f32.mrf.mxu0 }
  0xc9   : > { %v558_v48 = vsel %vm539_vm10, %v342_v47, 0.0  ;;  %vm544_vm10 = vmand %vm506_vm8, %vm525_vm9  ;;  %vm511_vm9 = vcmp.ge.s32.totalorder %v492_v11, 0 }
  0xca   : > { %830 = vmatmul.msk.f32.gmra.mxu1 %vm576_vm4, %v558_v48  ;;  %v563_v0 = vsel %vm544_vm10, %v357_v59, 0.0  ;;  %vm548_vm8 = vmand %vm510_vm5, %vm529_vm6  ;;  %vm530_vm10 = vcmp.lt.s32.totalorder %v492_v11, 3 }
  0xcb   : > { %v567_v13 = vsel %vm548_vm8, %v369_v10, 0.0 }
  0xce   : > { %v372_v15 = vpop.f32.mrf.mxu3 }
  0xd0   : > { %v345_v51 = vpop.f32.mrf.mxu0 }
  0xd1   : > { %v559_v52 = vsel %vm540_vm13, %v345_v51, 0.0  ;;  %vm545_vm13 = vmand %vm507_vm11, %vm526_vm12  ;;  %vm512_vm12 = vcmp.ge.s32.totalorder %v493_v16, 0 }
  0xd2   : > { %831 = vmatmul.msk.f32.gmra.mxu1 %vm576_vm4, %v559_v52  ;;  %v564_v3 = vsel %vm545_vm13, %v360_v62, 0.0  ;;  %vm549_vm11 = vmand %vm511_vm9, %vm530_vm10  ;;  %vm531_vm13 = vcmp.lt.s32.totalorder %v493_v16, 3 }
  0xd3   : > { %v568_v18 = vsel %vm549_vm11, %v372_v15, 0.0 }
  0xd6   : > { %v375_v19 = vpop.f32.mrf.mxu3 }
  0xd8   : > { %v348_v54 = vpop.f32.mrf.mxu0 }
  0xd9   : > { %v560_v55 = vsel %vm541_vm0, %v348_v54, 0.0  ;;  %vm546_vm0 = vmand %vm508_vm14, %vm527_vm15 }
  0xda   : > { %832 = vmatmul.msk.f32.vlgmr.msra.gmra.mxu2 %vm576_vm4, %v560_v55  ;;  %v565_v6 = vsel %vm546_vm0, %v363_v2, 0.0  ;;  %vm550_vm14 = vmand %vm512_vm12, %vm531_vm13 }
  0xdb   : > { %v569_v5 = vsel %vm550_vm14, %v375_v19, 0.0 }
  0xe2   : > { %833 = vmatmul.msk.f32.gmra.mxu2 %vm576_vm4, %v561_v58 }
  0xea   : > { %834 = vmatmul.msk.f32.gmra.mxu2 %vm576_vm4, %v562_v61 }
  0xf2   : > { %835 = vmatmul.msk.f32.gmra.mxu2 %vm576_vm4, %v563_v0 }
  0xfa   : > { %836 = vmatmul.msk.f32.gmra.mxu2 %vm576_vm4, %v564_v3 }
 0x102   : > { %837 = vmatmul.msk.f32.gmra.mxu2 %vm576_vm4, %v565_v6 }
 0x10a   : > { %838 = vmatmul.msk.f32.gmra.mxu2 %vm576_vm4, %v566_v9 }
 0x10f   : > { %v651_v12 = vpop.f32.mrf.mxu1 }
 0x110   : > { %709 = vst.msk [vmem:[%s1074_s22] sm:$0xff] %vm708_vm7, %v651_v12 }
 0x112   : > { %839 = vmatmul.msk.f32.gmra.mxu2 %vm576_vm4, %v567_v13 }
 0x117   : > { %v654_v17 = vpop.f32.mrf.mxu1 }
 0x118   : > { %710 = vst.msk [vmem:[%s1074_s22 + $0x8] sm:$0xff] %vm708_vm7, %v654_v17 }
 0x11a   : > { %840 = vmatmul.msk.f32.gmra.mxu2 %vm576_vm4, %v568_v18 }
 0x11f   : > { %v657_v20 = vpop.f32.mrf.mxu1 }
 0x120   : > { %711 = vst.msk [vmem:[%s1074_s22 + $0x10] sm:$0xff] %vm708_vm7, %v657_v20 }
 0x122   : > { %841 = vmatmul.msk.f32.gmra.mxu2 %vm576_vm4, %v569_v5 }
 0x127   : > { %v660_v21 = vpop.f32.mrf.mxu1 }
 0x128   : > { %712 = vst.msk [vmem:[%s1074_s22 + $0x18] sm:$0xff] %vm708_vm7, %v660_v21 }
 0x12f   : > { %v663_v22 = vpop.f32.mrf.mxu1 }
 0x130   : > { %713 = vst.msk [vmem:[%s1074_s22 + $0x20] sm:$0xff] %vm708_vm7, %v663_v22 }
 0x137   : > { %v666_v23 = vpop.f32.mrf.mxu1 }
 0x138   : > { %714 = vst.msk [vmem:[%s1074_s22 + $0x28] sm:$0xff] %vm708_vm7, %v666_v23 }
 0x13f   : > { %v669_v24 = vpop.f32.mrf.mxu1 }
 0x140   : > { %715 = vst.msk [vmem:[%s1074_s22 + $0x30] sm:$0xff] %vm708_vm7, %v669_v24 }
 0x147   : > { %v672_v25 = vpop.f32.mrf.mxu1 }
 0x148   : > { %716 = vst.msk [vmem:[%s1074_s22 + $0x38] sm:$0xff] %vm708_vm7, %v672_v25 }
 0x14f   : > { %v675_v26 = vpop.f32.mrf.mxu1 }
 0x150   : > { %717 = vst.msk [vmem:[%s1074_s22 + $0x40] sm:$0xff] %vm708_vm7, %v675_v26 }
 0x15d   : > { %v678_v27 = vpop.f32.mrf.mxu2 }
 0x15e   : > { %718 = vst.msk [vmem:[%s1074_s22 + $0x48] sm:$0xff] %vm708_vm7, %v678_v27 }
 0x165   : > { %v681_v28 = vpop.f32.mrf.mxu2 }
 0x166   : > { %719 = vst.msk [vmem:[%s1074_s22 + $0x50] sm:$0xff] %vm708_vm7, %v681_v28 }
 0x16d   : > { %v684_v29 = vpop.f32.mrf.mxu2 }
 0x16e   : > { %720 = vst.msk [vmem:[%s1074_s22 + $0x58] sm:$0xff] %vm708_vm7, %v684_v29 }
 0x175   : > { %v687_v30 = vpop.f32.mrf.mxu2 }
 0x176   : > { %721 = vst.msk [vmem:[%s1074_s22 + $0x60] sm:$0xff] %vm708_vm7, %v687_v30 }
 0x17d   : > { %v690_v31 = vpop.f32.mrf.mxu2 }
 0x17e   : > { %722 = vst.msk [vmem:[%s1074_s22 + $0x68] sm:$0xff] %vm708_vm7, %v690_v31 }
 0x185   : > { %v693_v32 = vpop.f32.mrf.mxu2 }
 0x186   : > { %723 = vst.msk [vmem:[%s1074_s22 + $0x70] sm:$0xff] %vm708_vm7, %v693_v32 }
 0x18d   : > { %v696_v33 = vpop.f32.mrf.mxu2 }
 0x18e   : > { %724 = vst.msk [vmem:[%s1074_s22 + $0x78] sm:$0xff] %vm708_vm7, %v696_v33 }
 0x195   : > { %v699_v34 = vpop.f32.mrf.mxu2 }
 0x196   : > { %725 = vst.msk [vmem:[%s1074_s22 + $0x80] sm:$0xff] %vm708_vm7, %v699_v34 }
 0x19d   : > { %v702_v35 = vpop.f32.mrf.mxu2 }
 0x19e   : > { %726 = vst.msk [vmem:[%s1074_s22 + $0x88] sm:$0xff] %vm708_vm7, %v702_v35 }
 0x1a5   : > { %v705_v36 = vpop.f32.mrf.mxu2 }
 0x1a6   : > { %727 = vst.msk [vmem:[%s1074_s22 + $0x90] sm:$0xff] %vm708_vm7, %v705_v36 }
 0x1a7 PF: > { %s14_s15 = sadd.s32 1, %s872_s15  }
 0x1a8   : > { %p11_p4 = scmp.ge.s32.totalorder %s14_s15, 4  }
 0x1aa   :  { %13 = sbr.rel (!%p11_p4) target bundleno = 1 (0x1), region = 69 }

</bundles_post_ra>
